<compile_context>
chip_gen: v5e
topology: v5e:2x2
jax: 0.10.0
libtpu: 0.0.40
codegen_flags: <defaults>
</compile_context>

<pallas_src>
import jax
import jax.numpy as jnp
from jax.experimental import pallas as pl
from jax.experimental.pallas import tpu as pltpu


LANE = 128


def _round_up(n, m):
    return ((n + m - 1) // m) * m


def _sigmoid(x):
    # exp on EUP, reciprocal on EUP (approx) -> no f32 VALU divide in the hot loop.
    return pl.reciprocal(1.0 + jnp.exp(-x), approx=True)


def simple_classifier_kernel(x_ref, w1_ref, b1_ref, w2_ref, b2_ref, w3_ref, b3_ref, o_ref):
    # Layer 1 (pre-scale already folded into w1/b1): Linear + Sigmoid
    h1 = jnp.dot(x_ref[...], w1_ref[...], preferred_element_type=jnp.float32) + b1_ref[...]
    h1 = _sigmoid(h1).astype(w2_ref.dtype)

    # Layer 2: Linear + Sigmoid
    h2 = jnp.dot(h1, w2_ref[...], preferred_element_type=jnp.float32) + b2_ref[...]
    h2 = _sigmoid(h2).astype(w3_ref.dtype)

    # Output layer: Linear (no activation)
    o_ref[...] = (
        jnp.dot(h2, w3_ref[...], preferred_element_type=jnp.float32) + b3_ref[...]
    ).astype(o_ref.dtype)


def simple_classifier_forward(x, me, st, params, *, batch_tile=512,
                              compute_dtype=jnp.float32):
    """x: (B, F0) float32.  params: list of (W_t, b) with W_t shape (in, out).

    compute_dtype: jnp.float32 (exact) or jnp.bfloat16 (v6e/v7x MXU-native inputs,
    f32 accumulation).
    """
    B, F0 = x.shape
    (w1, b1), (w2, b2), (w3, b3) = params
    F1, F2, F3 = w1.shape[1], w2.shape[1], w3.shape[1]

    # ---- Fold affine pre-scale (x - Me) * (1/St) into layer 1 (wrapper-side, one time).
    inv_st = 1.0 / st
    w1f = w1 * inv_st[:, None]                 # (F0, F1)
    b1f = b1 - (me * inv_st) @ w1              # (F1,)

    # ---- Pad feature dims to 128 lanes (lane-dense matmuls and unmasked stores).
    # Padded columns of layer i produce sigmoid(0)=0.5, but the corresponding rows
    # of layer i+1's weights are zero, so they contribute nothing to real outputs.
    F1p, F2p, F3p = _round_up(F1, LANE), _round_up(F2, LANE), _round_up(F3, LANE)

    w1p = jnp.zeros((F0, F1p), jnp.float32).at[:, :F1].set(w1f)
    w2p = jnp.zeros((F1p, F2p), jnp.float32).at[:F1, :F2].set(w2)
    w3p = jnp.zeros((F2p, F3p), jnp.float32).at[:F2, :F3].set(w3)
    b1p = jnp.zeros((1, F1p), jnp.float32).at[0, :F1].set(b1f)
    b2p = jnp.zeros((1, F2p), jnp.float32).at[0, :F2].set(b2)
    b3p = jnp.zeros((1, F3p), jnp.float32).at[0, :F3].set(b3)

    # ---- Batch tiling: big tiles, zero-pad ragged batches, slice result back.
    bt = max(8, min(batch_tile, _round_up(B, 8)))
    Bp = _round_up(B, bt)
    xp = x if Bp == B else jnp.zeros((Bp, F0), x.dtype).at[:B].set(x)

    # bf16 (v6e/v7x) or f32 matmul inputs; biases / accumulation / output stay f32.
    xp = xp.astype(compute_dtype)
    w1p = w1p.astype(compute_dtype)
    w2p = w2p.astype(compute_dtype)
    w3p = w3p.astype(compute_dtype)

    grid = (Bp // bt,)

    out = pl.pallas_call(
        simple_classifier_kernel,
        out_shape=jax.ShapeDtypeStruct((Bp, F3p), jnp.float32),
        grid_spec=pltpu.PrefetchScalarGridSpec(
            num_scalar_prefetch=0,
            grid=grid,
            in_specs=[
                pl.BlockSpec((bt, F0), lambda i: (i, 0)),     # x tile (streams)
                pl.BlockSpec((F0, F1p), lambda i: (0, 0)),    # W1' (folded, resident)
                pl.BlockSpec((1, F1p), lambda i: (0, 0)),     # b1'
                pl.BlockSpec((F1p, F2p), lambda i: (0, 0)),   # W2
                pl.BlockSpec((1, F2p), lambda i: (0, 0)),     # b2
                pl.BlockSpec((F2p, F3p), lambda i: (0, 0)),   # W3
                pl.BlockSpec((1, F3p), lambda i: (0, 0)),     # b3
            ],
            out_specs=pl.BlockSpec((bt, F3p), lambda i: (i, 0)),
        ),
        compiler_params=pltpu.CompilerParams(
            dimension_semantics=("parallel",),
        ),
    )(xp, w1p, b1p, w2p, b2p, w3p, b3p)

    return out[:B, :F3]


def init_params(key, architecture):
    """Deterministic init matching nn.Linear shapes.

    Returns list of (W_transposed (in, out), bias (out,)) per layer.
    """
    params = []
    for i in range(len(architecture) - 1):
        fan_in, fan_out = architecture[i], architecture[i + 1]
        key, kw, kb = jax.random.split(key, 3)
        bound = 1.0 / jnp.sqrt(fan_in)
        w = jax.random.uniform(kw, (fan_out, fan_in), jnp.float32, -bound, bound)
        b = jax.random.uniform(kb, (fan_out,), jnp.float32, -bound, bound)
        params.append((w.T, b))  # pre-transpose so kernel does x @ W_t
    return params


def reference_forward(x, me, st, params):
    f = (x - me) * (1.0 / st)
    (w1, b1), (w2, b2), (w3, b3) = params
    f = jax.nn.sigmoid(f @ w1 + b1)
    f = jax.nn.sigmoid(f @ w2 + b2)
    return f @ w3 + b3


# TODO(synk): .save()/setscaling()/file-loading __init__ paths are host-side utilities
# with no kernel equivalent; only forward() (including the scale() pre-step) is implemented.

if __name__ == "__main__":
    # Architecture = [in_features, hidden1, hidden2, out] -> 2x (Lin+Sig) + final Lin
    architecture = [16, 32, 32, 4]
    batch = 64

    key = jax.random.PRNGKey(0)
    key, kx, kme, kst = jax.random.split(key, 4)

    x = jax.random.normal(kx, (batch, architecture[0]), jnp.float32)
    # Default __init__ gives Me=0, St=1; use nontrivial deterministic values to
    # exercise the scale() path (as if setscaling() had been called).
    me = jax.random.normal(kme, (architecture[0],), jnp.float32) * 0.1
    st = 1.0 + jax.random.uniform(kst, (architecture[0],), jnp.float32)

    params = init_params(key, architecture)
    ref = reference_forward(x, me, st, params)

    # f32 compute path (tolerance covers the EUP approx-reciprocal in sigmoid).
    out = simple_classifier_forward(x, me, st, params, compute_dtype=jnp.float32)
    out = jax.block_until_ready(out)
    assert out.shape == (batch, architecture[-1])
    assert jnp.allclose(out, ref, atol=2e-3, rtol=2e-3), "f32 kernel mismatch vs reference"

    # bf16 matmul-input path (v6e/v7x MXU-native); looser tolerance.
    out_bf16 = simple_classifier_forward(x, me, st, params, compute_dtype=jnp.bfloat16)
    out_bf16 = jax.block_until_ready(out_bf16)
    assert jnp.allclose(out_bf16, ref, atol=1e-1, rtol=1e-1), "bf16 kernel mismatch vs reference"

    print("KERNEL_OK")
</pallas_src>

<mosaic_0001>
module attributes {stable_mosaic.version = 11 : i64} {
  func.func @simple_classifier_kernel(%arg0: i32, %arg1: memref<64x16xf32, #tpu.memory_space<vmem>>, %arg2: memref<16x128xf32, #tpu.memory_space<vmem>>, %arg3: memref<1x128xf32, #tpu.memory_space<vmem>>, %arg4: memref<128x128xf32, #tpu.memory_space<vmem>>, %arg5: memref<1x128xf32, #tpu.memory_space<vmem>>, %arg6: memref<128x128xf32, #tpu.memory_space<vmem>>, %arg7: memref<1x128xf32, #tpu.memory_space<vmem>>, %arg8: memref<64x128xf32, #tpu.memory_space<vmem>>) attributes {dimension_semantics = [#tpu.dimension_semantics<parallel>], iteration_bounds = array<i64: 1>, scalar_prefetch = 0 : i64, scratch_operands = 0 : i64, tpu.core_type = #tpu.core_type<tc>, window_params = [{transform_indices = @transform_0, window_bounds = array<i64: 64, 16>}, {pipeline_mode = #tpu.pipeline_mode<synchronous>, transform_indices = @transform_1, window_bounds = array<i64: 16, 128>}, {pipeline_mode = #tpu.pipeline_mode<synchronous>, transform_indices = @transform_2, window_bounds = array<i64: 1, 128>}, {pipeline_mode = #tpu.pipeline_mode<synchronous>, transform_indices = @transform_3, window_bounds = array<i64: 128, 128>}, {pipeline_mode = #tpu.pipeline_mode<synchronous>, transform_indices = @transform_4, window_bounds = array<i64: 1, 128>}, {pipeline_mode = #tpu.pipeline_mode<synchronous>, transform_indices = @transform_5, window_bounds = array<i64: 128, 128>}, {pipeline_mode = #tpu.pipeline_mode<synchronous>, transform_indices = @transform_6, window_bounds = array<i64: 1, 128>}, {transform_indices = @transform_7, window_bounds = array<i64: 64, 128>}]} {
    %c0 = arith.constant 0 : index
    %c0_0 = arith.constant 0 : index
    %0 = vector.load %arg1[%c0, %c0_0] : memref<64x16xf32, #tpu.memory_space<vmem>>, vector<64x16xf32>
    %c0_1 = arith.constant 0 : index
    %c0_2 = arith.constant 0 : index
    %1 = vector.load %arg2[%c0_1, %c0_2] : memref<16x128xf32, #tpu.memory_space<vmem>>, vector<16x128xf32>
    %cst = arith.constant dense<0.000000e+00> : vector<64x128xf32>
    %2 = tpu.matmul %0, %1, %cst {dimension_numbers = #tpu.dot_dimension_numbers<[1], [0], [0], [1], [0, 0, 1, 1], [], []>} : vector<64x16xf32>, vector<16x128xf32>, vector<64x128xf32> -> vector<64x128xf32>
    %c0_3 = arith.constant 0 : index
    %c0_4 = arith.constant 0 : index
    %3 = vector.load %arg3[%c0_3, %c0_4] : memref<1x128xf32, #tpu.memory_space<vmem>>, vector<1x128xf32>
    %4 = vector.broadcast %3 : vector<1x128xf32> to vector<64x128xf32>
    %5 = arith.addf %2, %4 : vector<64x128xf32>
    %cst_5 = arith.constant 0.000000e+00 : f32
    %6 = vector.broadcast %cst_5 : f32 to vector<64x128xf32>
    %7 = arith.subf %6, %5 : vector<64x128xf32>
    %8 = math.exp %7 : vector<64x128xf32>
    %cst_6 = arith.constant 1.000000e+00 : f32
    %9 = vector.broadcast %cst_6 : f32 to vector<64x128xf32>
    %10 = arith.addf %9, %8 : vector<64x128xf32>
    %11 = tpu.reciprocal %10 {approx = true} : vector<64x128xf32> -> vector<64x128xf32>
    %c0_7 = arith.constant 0 : index
    %c0_8 = arith.constant 0 : index
    %12 = vector.load %arg4[%c0_7, %c0_8] : memref<128x128xf32, #tpu.memory_space<vmem>>, vector<128x128xf32>
    %cst_9 = arith.constant dense<0.000000e+00> : vector<64x128xf32>
    %13 = tpu.matmul %11, %12, %cst_9 {dimension_numbers = #tpu.dot_dimension_numbers<[1], [0], [0], [1], [0, 0, 1, 1], [], []>} : vector<64x128xf32>, vector<128x128xf32>, vector<64x128xf32> -> vector<64x128xf32>
    %c0_10 = arith.constant 0 : index
    %c0_11 = arith.constant 0 : index
    %14 = vector.load %arg5[%c0_10, %c0_11] : memref<1x128xf32, #tpu.memory_space<vmem>>, vector<1x128xf32>
    %15 = vector.broadcast %14 : vector<1x128xf32> to vector<64x128xf32>
    %16 = arith.addf %13, %15 : vector<64x128xf32>
    %cst_12 = arith.constant 0.000000e+00 : f32
    %17 = vector.broadcast %cst_12 : f32 to vector<64x128xf32>
    %18 = arith.subf %17, %16 : vector<64x128xf32>
    %19 = math.exp %18 : vector<64x128xf32>
    %cst_13 = arith.constant 1.000000e+00 : f32
    %20 = vector.broadcast %cst_13 : f32 to vector<64x128xf32>
    %21 = arith.addf %20, %19 : vector<64x128xf32>
    %22 = tpu.reciprocal %21 {approx = true} : vector<64x128xf32> -> vector<64x128xf32>
    %c0_14 = arith.constant 0 : index
    %c0_15 = arith.constant 0 : index
    %23 = vector.load %arg6[%c0_14, %c0_15] : memref<128x128xf32, #tpu.memory_space<vmem>>, vector<128x128xf32>
    %cst_16 = arith.constant dense<0.000000e+00> : vector<64x128xf32>
    %24 = tpu.matmul %22, %23, %cst_16 {dimension_numbers = #tpu.dot_dimension_numbers<[1], [0], [0], [1], [0, 0, 1, 1], [], []>} : vector<64x128xf32>, vector<128x128xf32>, vector<64x128xf32> -> vector<64x128xf32>
    %c0_17 = arith.constant 0 : index
    %c0_18 = arith.constant 0 : index
    %25 = vector.load %arg7[%c0_17, %c0_18] : memref<1x128xf32, #tpu.memory_space<vmem>>, vector<1x128xf32>
    %26 = vector.broadcast %25 : vector<1x128xf32> to vector<64x128xf32>
    %27 = arith.addf %24, %26 : vector<64x128xf32>
    %c0_19 = arith.constant 0 : index
    %c0_20 = arith.constant 0 : index
    %28 = vector.load %arg8[%c0_19, %c0_20] : memref<64x128xf32, #tpu.memory_space<vmem>>, vector<64x128xf32>
    tpu.vector_store %arg8[%c0_19, %c0_20], %27 {strides = array<i32>} : memref<64x128xf32, #tpu.memory_space<vmem>>, vector<64x128xf32>,
    return
  }
  func.func @transform_0(%arg0: i32) -> (i32, i32) {
    %c0_i32 = arith.constant 0 : i32
    %c0_i32_0 = arith.constant 0 : i32
    return %arg0, %c0_i32 : i32, i32
  }
  func.func @transform_1(%arg0: i32) -> (i32, i32) {
    %c0_i32 = arith.constant 0 : i32
    %c0_i32_0 = arith.constant 0 : i32
    %c0_i32_1 = arith.constant 0 : i32
    return %c0_i32, %c0_i32_0 : i32, i32
  }
  func.func @transform_2(%arg0: i32) -> (i32, i32) {
    %c0_i32 = arith.constant 0 : i32
    %c0_i32_0 = arith.constant 0 : i32
    %c0_i32_1 = arith.constant 0 : i32
    return %c0_i32, %c0_i32_0 : i32, i32
  }
  func.func @transform_3(%arg0: i32) -> (i32, i32) {
    %c0_i32 = arith.constant 0 : i32
    %c0_i32_0 = arith.constant 0 : i32
    %c0_i32_1 = arith.constant 0 : i32
    return %c0_i32, %c0_i32_0 : i32, i32
  }
  func.func @transform_4(%arg0: i32) -> (i32, i32) {
    %c0_i32 = arith.constant 0 : i32
    %c0_i32_0 = arith.constant 0 : i32
    %c0_i32_1 = arith.constant 0 : i32
    return %c0_i32, %c0_i32_0 : i32, i32
  }
  func.func @transform_5(%arg0: i32) -> (i32, i32) {
    %c0_i32 = arith.constant 0 : i32
    %c0_i32_0 = arith.constant 0 : i32
    %c0_i32_1 = arith.constant 0 : i32
    return %c0_i32, %c0_i32_0 : i32, i32
  }
  func.func @transform_6(%arg0: i32) -> (i32, i32) {
    %c0_i32 = arith.constant 0 : i32
    %c0_i32_0 = arith.constant 0 : i32
    %c0_i32_1 = arith.constant 0 : i32
    return %c0_i32, %c0_i32_0 : i32, i32
  }
  func.func @transform_7(%arg0: i32) -> (i32, i32) {
    %c0_i32 = arith.constant 0 : i32
    %c0_i32_0 = arith.constant 0 : i32
    return %arg0, %c0_i32 : i32, i32
  }
}

</mosaic_0001>

<bundles_post_ra>
// kernel: tpu_custom_call.1
= control target key start
LH: loop header
LB: loop body
LE: loop exit
PB: predicated region body
PF: predicated region fallthrough
CT: control target
= control target key end

     0   :  { %12 = vsyncpa [#allocation3], 0  ;;  %s689_s0 = inlined_call_operand.vmem [shape: f32[64,16], index: 0, kind: input, shape index: {}]   ;;  %s690_s1 = inlined_call_operand.vmem [shape: f32[16,128], index: 1, kind: input, shape index: {}]   ;;  %s691_s2 = inlined_call_operand.vmem [shape: f32[1,128], index: 2, kind: input, shape index: {}]   ;;  %s692_s3 = inlined_call_operand.hbm [shape: f32[128,128], index: 3, kind: input, shape index: {}]   ;;  %s693_s4 = inlined_call_operand.vmem [shape: f32[1,128], index: 4, kind: input, shape index: {}]   ;;  %s694_s5 = inlined_call_operand.hbm [shape: f32[128,128], index: 5, kind: input, shape index: {}]   ;;  %s695_s6 = inlined_call_operand.vmem [shape: f32[1,128], index: 6, kind: input, shape index: {}]   ;;  %s696_s7 = inlined_call_operand.hbm [shape: f32[64,128], index: 7, kind: output, shape index: {}]  }
   0x1   :  { %13 = vsyncpa [#allocation6], 0 }
   0x2   :  { %14 = vsyncpa [#allocation4], 0  ;;  %s25_s26 = sshll.u32 %s692_s3, 4  ;;  %s559_s27 = smov [#allocation2]   ;;  %s26_s26 = int_to_ptr.hbm [resolvable:$true] %s25_s26 }
   0x3   :  { %s27_s28 = sshll.u32 %s559_s27, 4  ;;  %s40_s8 = sshll.u32 %s694_s5, 4  ;;  %s28_s28 = int_to_ptr.vmem [resolvable:$true] %s27_s28  ;;  %s41_s8 = int_to_ptr.hbm [resolvable:$true] %s40_s8 }
   0x4   :  { %s560_s9 = smov 128   ;;  %s561_s10 = smov 8  }
   0x5   :  { %33 = dma.hbm_to_vmem [thread:$0]  %s26_s26, 2048, %s28_s28, [#allocation3], %s560_s9, %s560_s9, %s561_s10  }
   0x6   :  { %s562_s11 = smov [#allocation5]  }
   0x7   :  { %s42_s12 = sshll.u32 %s562_s11, 4  ;;  %s43_s12 = int_to_ptr.vmem [resolvable:$true] %s42_s12 }
   0x8   :  { %48 = dma.hbm_to_vmem [thread:$0]  %s41_s8, 2048, %s43_s12, [#allocation6], %s560_s9, %s560_s9, %s561_s10  }
   0x9   :  { %553 = dma.done.wait [#allocation3], 2048  }
   0xa   :  { %554 = vsyncadd [#allocation3], 4294965248 }
   0xb   :  { %555 = dma.done.wait [#allocation6], 2048  }
   0xc   :  { %556 = vsyncadd [#allocation6], 4294965248  ;;  %v68_v0 = vld [vmem:[%s690_s1 + $0x8] sm:$0xff]  ;;  %v67_v1 = vld [vmem:[%s690_s1] sm:$0xff]  ;;  %vm73_vm0 = vcmask 130048   ;;  %s355_s13 = sshll.u32 %s696_s7, 4  ;;  %s356_s13 = int_to_ptr.hbm [resolvable:$true] %s355_s13 }
   0xd   :  { %112 = vmatpush.msra.mxu0 %v68_v0  ;;  %v59_v2 = vld [vmem:[%s689_s0] sm:$0xff]  ;;  %v60_v3 = vld [vmem:[%s689_s0 + $0x8] sm:$0xff]  ;;  %v61_v4 = vld [vmem:[%s689_s0 + $0x10] sm:$0xff] }
   0xe   :  { %v62_v5 = vld [vmem:[%s689_s0 + $0x18] sm:$0xff]  ;;  %v193_v7 = vld [vmem:[#allocation2 + $0x70] sm:$0xff]  ;;  %v192_v8 = vld [vmem:[#allocation2 + $0x68] sm:$0xff] }
   0xf   :  { %113 = vmatpush.msra.mxu0 %v67_v1  ;;  %v194_v6 = vld [vmem:[#allocation2 + $0x78] sm:$0xff]  ;;  %v191_v9 = vld [vmem:[#allocation2 + $0x60] sm:$0xff]  ;;  %v64_v11 = vld [vmem:[%s689_s0 + $0x28] sm:$0xff] }
  0x10   :  { %369 = vmatmul.msk.f32.vlgmr.msra.gmra.mxu0 %vm73_vm0, %v59_v2  ;;  %199 = vmatpush.msra.mxu1 %v194_v6  ;;  %v63_v10 = vld [vmem:[%s689_s0 + $0x20] sm:$0xff]  ;;  %v65_v12 = vld [vmem:[%s689_s0 + $0x30] sm:$0xff]  ;;  %v66_v13 = vld [vmem:[%s689_s0 + $0x38] sm:$0xff] }
  0x11   :  { %377 = vmatpush.msra.mxu3 %v194_v6  ;;  %v190_v14 = vld [vmem:[#allocation2 + $0x58] sm:$0xff]  ;;  %v189_v15 = vld [vmem:[#allocation2 + $0x50] sm:$0xff]  ;;  %v188_v16 = vld [vmem:[#allocation2 + $0x48] sm:$0xff] }
  0x12   :  { %200 = vmatpush.msra.mxu1 %v193_v7  ;;  %v187_v17 = vld [vmem:[#allocation2 + $0x40] sm:$0xff]  ;;  %v186_v18 = vld [vmem:[#allocation2 + $0x38] sm:$0xff]  ;;  %v185_v19 = vld [vmem:[#allocation2 + $0x30] sm:$0xff] }
  0x13   :  { %378 = vmatpush.msra.mxu3 %v193_v7  ;;  %v184_v20 = vld [vmem:[#allocation2 + $0x28] sm:$0xff]  ;;  %v183_v21 = vld [vmem:[#allocation2 + $0x20] sm:$0xff]  ;;  %v182_v22 = vld [vmem:[#allocation2 + $0x18] sm:$0xff] }
  0x14   :  { %201 = vmatpush.msra.mxu1 %v192_v8  ;;  %v181_v23 = vld [vmem:[#allocation2 + $0x10] sm:$0xff]  ;;  %v180_v24 = vld [vmem:[#allocation2 + $0x8] sm:$0xff]  ;;  %v179_v25 = vld [vmem:[#allocation2] sm:$0xff] }
  0x15   :  { %379 = vmatpush.msra.mxu3 %v192_v8  ;;  %v657_v26 = vld [vmem:[%s691_s2] ss:$0 sm:$0xff]  ;;  %v295_v1 = vld [vmem:[#allocation5 + $0x78] sm:$0xff]  ;;  %v294_v2 = vld [vmem:[#allocation5 + $0x70] sm:$0xff] }
  0x16   :  { %202 = vmatpush.msra.mxu1 %v191_v9  ;;  %300 = vmatpush.msra.mxu2 %v295_v1  ;;  %v292_v7 = vld [vmem:[#allocation5 + $0x60] sm:$0xff] }
  0x17   :  { %380 = vmatpush.msra.mxu3 %v191_v9 }
  0x18   :  { %370 = vmatmul.msk.f32.gmra.mxu0 %vm73_vm0, %v60_v3  ;;  %203 = vmatpush.msra.mxu1 %v190_v14 }
  0x19   :  { %381 = vmatpush.msra.mxu3 %v190_v14  ;;  %301 = vmatpush.msra.mxu2 %v294_v2 }
  0x1a   :  { %204 = vmatpush.msra.mxu1 %v189_v15 }
  0x1b   :  { %382 = vmatpush.msra.mxu3 %v189_v15 }
  0x1c   :  { %205 = vmatpush.msra.mxu1 %v188_v16 }
  0x1d   :  { %383 = vmatpush.msra.mxu3 %v188_v16 }
  0x1e   :  { %206 = vmatpush.msra.mxu1 %v187_v17 }
  0x1f   :  { %384 = vmatpush.msra.mxu3 %v187_v17 }
  0x20   :  { %371 = vmatmul.msk.f32.gmra.mxu0 %vm73_vm0, %v61_v4  ;;  %207 = vmatpush.msra.mxu1 %v186_v18 }
  0x21   :  { %385 = vmatpush.msra.mxu3 %v186_v18 }
  0x22   :  { %208 = vmatpush.msra.mxu1 %v185_v19 }
  0x23   :  { %386 = vmatpush.msra.mxu3 %v185_v19 }
  0x24   :  { %209 = vmatpush.msra.mxu1 %v184_v20 }
  0x25   :  { %387 = vmatpush.msra.mxu3 %v184_v20 }
  0x26   :  { %210 = vmatpush.msra.mxu1 %v183_v21 }
  0x27   :  { %388 = vmatpush.msra.mxu3 %v183_v21 }
  0x28   :  { %372 = vmatmul.msk.f32.gmra.mxu0 %vm73_vm0, %v62_v5  ;;  %211 = vmatpush.msra.mxu1 %v182_v22  ;;  %v293_v5 = vld [vmem:[#allocation5 + $0x68] sm:$0xff] }
  0x29   :  { %389 = vmatpush.msra.mxu3 %v182_v22  ;;  %302 = vmatpush.msra.mxu2 %v293_v5 }
  0x2a   :  { %212 = vmatpush.msra.mxu1 %v181_v23 }
  0x2b   :  { %390 = vmatpush.msra.mxu3 %v181_v23  ;;  %303 = vmatpush.msra.mxu2 %v292_v7  ;;  %v291_v23 = vld [vmem:[#allocation5 + $0x58] sm:$0xff] }
  0x2c   :  { %213 = vmatpush.msra.mxu1 %v180_v24 }
  0x2d   :  { %391 = vmatpush.msra.mxu3 %v180_v24  ;;  %304 = vmatpush.msra.mxu2 %v291_v23  ;;  %v290_v24 = vld [vmem:[#allocation5 + $0x50] sm:$0xff] }
  0x2e   :  { %214 = vmatpush.msra.mxu1 %v179_v25 }
  0x2f   :  { %392 = vmatpush.msra.mxu3 %v179_v25  ;;  %305 = vmatpush.msra.mxu2 %v290_v24  ;;  %v289_v25 = vld [vmem:[#allocation5 + $0x48] sm:$0xff] }
  0x30   :  { %373 = vmatmul.msk.f32.gmra.mxu0 %vm73_vm0, %v63_v10 }
  0x31   :  { %393 = vmatpush.msrb.mxu3 %v295_v1  ;;  %306 = vmatpush.msra.mxu2 %v289_v25 }
  0x33   :  { %394 = vmatpush.msrb.mxu3 %v294_v2 }
  0x35   :  { %395 = vmatpush.msrb.mxu3 %v293_v5 }
  0x37   :  { %396 = vmatpush.msrb.mxu3 %v292_v7 }
  0x38   :  { %374 = vmatmul.msk.f32.gmra.mxu0 %vm73_vm0, %v64_v11 }
  0x39   :  { %397 = vmatpush.msrb.mxu3 %v291_v23 }
  0x3b   :  { %398 = vmatpush.msrb.mxu3 %v290_v24 }
  0x3d   :  { %399 = vmatpush.msrb.mxu3 %v289_v25 }
  0x40   :  { %375 = vmatmul.msk.f32.gmra.mxu0 %vm73_vm0, %v65_v12 }
  0x48   :  { %376 = vmatmul.msk.f32.gmra.mxu0 %vm73_vm0, %v66_v13 }
  0x8d   :  { %v115_v27 = vpop.f32.mrf.mxu0 }
  0x8e   :  { %v116_v28 = vadd.f32 %v657_v26, %v115_v27  ;;  %v287_v27 = vld [vmem:[#allocation5 + $0x38] sm:$0xff] }
  0x90   :  { %v139_v29 = vsub.f32 0.0, %v116_v28  ;;  %v286_v28 = vld [vmem:[#allocation5 + $0x30] sm:$0xff] }
  0x92   :  { %v147_v30 = vmul.f32 1.442695, %v139_v29  ;;  %v285_v29 = vld [vmem:[#allocation5 + $0x28] sm:$0xff] }
  0x94   :  { %417 = vpow2.f32 %v147_v30  ;;  %v284_v30 = vld [vmem:[#allocation5 + $0x20] sm:$0xff] }
  0x95   :  { %v118_v31 = vpop.f32.mrf.mxu0 }
  0x96   :  { %v119_v32 = vadd.f32 %v657_v26, %v118_v31  ;;  %v283_v31 = vld [vmem:[#allocation5 + $0x18] sm:$0xff] }
  0x98   :  { %v140_v33 = vsub.f32 0.0, %v119_v32  ;;  %v282_v32 = vld [vmem:[#allocation5 + $0x10] sm:$0xff] }
  0x9a   :  { %v418_v34 = vpop.eup %417  ;;  %v149_v35 = vmul.f32 1.442695, %v140_v33  ;;  %v281_v33 = vld [vmem:[#allocation5 + $0x8] sm:$0xff] }
  0x9b   :  { %v163_v36 = vadd.f32 1.0, %v418_v34  ;;  %v280_v34 = vld [vmem:[#allocation5] sm:$0xff] }
  0x9c   :  { %419 = vpow2.f32 %v149_v35  ;;  %v670_v35 = vld [vmem:[%s693_s4] ss:$0 sm:$0xff] }
  0x9d   :  { %421 = vrcp.f32 %v163_v36  ;;  %v121_v37 = vpop.f32.mrf.mxu0 }
  0x9e   :  { %v122_v38 = vadd.f32 %v657_v26, %v121_v37 }
  0xa0   :  { %v141_v39 = vsub.f32 0.0, %v122_v38 }
  0xa2   :  { %v420_v40 = vpop.eup %419  ;;  %v151_v41 = vmul.f32 1.442695, %v141_v39 }
  0xa3   :  { %v422_v42 = vpop.eup %421  ;;  %v164_v43 = vadd.f32 1.0, %v420_v40 }
  0xa4   :  { %423 = vpow2.f32 %v151_v41  ;;  %215 = vmatmul.f32.vlgmr.msra.gmra.mxu1 %v422_v42 }
  0xa5   :  { %425 = vrcp.f32 %v164_v43  ;;  %v124_v44 = vpop.f32.mrf.mxu0 }
  0xa6   :  { %v125_v45 = vadd.f32 %v657_v26, %v124_v44 }
  0xa8   :  { %v142_v46 = vsub.f32 0.0, %v125_v45 }
  0xaa   :  { %v424_v47 = vpop.eup %423  ;;  %v153_v48 = vmul.f32 1.442695, %v142_v46 }
  0xab   :  { %v426_v49 = vpop.eup %425  ;;  %v165_v50 = vadd.f32 1.0, %v424_v47 }
  0xac   :  { %427 = vpow2.f32 %v153_v48  ;;  %218 = vmatmul.f32.gmra.mxu1 %v426_v49 }
  0xad   :  { %429 = vrcp.f32 %v165_v50  ;;  %v127_v51 = vpop.f32.mrf.mxu0 }
  0xae   :  { %v128_v52 = vadd.f32 %v657_v26, %v127_v51 }
  0xb0   :  { %v143_v53 = vsub.f32 0.0, %v128_v52 }
  0xb2   :  { %v428_v54 = vpop.eup %427  ;;  %v155_v55 = vmul.f32 1.442695, %v143_v53 }
  0xb3   :  { %v430_v56 = vpop.eup %429  ;;  %v166_v57 = vadd.f32 1.0, %v428_v54 }
  0xb4   :  { %431 = vpow2.f32 %v155_v55  ;;  %221 = vmatmul.f32.gmra.mxu1 %v430_v56 }
  0xb5   :  { %433 = vrcp.f32 %v166_v57  ;;  %v130_v58 = vpop.f32.mrf.mxu0 }
  0xb6   :  { %v131_v59 = vadd.f32 %v657_v26, %v130_v58 }
  0xb8   :  { %v144_v60 = vsub.f32 0.0, %v131_v59 }
  0xba   :  { %v432_v61 = vpop.eup %431  ;;  %v157_v62 = vmul.f32 1.442695, %v144_v60 }
  0xbb   :  { %v434_v63 = vpop.eup %433  ;;  %v167_v0 = vadd.f32 1.0, %v432_v61 }
  0xbc   :  { %435 = vpow2.f32 %v157_v62  ;;  %224 = vmatmul.f32.gmra.mxu1 %v434_v63 }
  0xbd   :  { %437 = vrcp.f32 %v167_v0  ;;  %v133_v3 = vpop.f32.mrf.mxu0 }
  0xbe   :  { %v134_v4 = vadd.f32 %v657_v26, %v133_v3 }
  0xc0   :  { %v145_v6 = vsub.f32 0.0, %v134_v4 }
  0xc2   :  { %v436_v8 = vpop.eup %435  ;;  %v159_v9 = vmul.f32 1.442695, %v145_v6 }
  0xc3   :  { %v438_v10 = vpop.eup %437  ;;  %v168_v11 = vadd.f32 1.0, %v436_v8 }
  0xc4   :  { %439 = vpow2.f32 %v159_v9  ;;  %227 = vmatmul.f32.gmra.mxu1 %v438_v10 }
  0xc5   :  { %441 = vrcp.f32 %v168_v11  ;;  %v136_v12 = vpop.f32.mrf.mxu0 }
  0xc6   :  { %v137_v13 = vadd.f32 %v657_v26, %v136_v12  ;;  %v288_v26 = vld [vmem:[#allocation5 + $0x40] sm:$0xff] }
  0xc7   :  { %307 = vmatpush.msra.mxu2 %v288_v26  ;;  %400 = vmatpush.msrb.mxu3 %v288_v26 }
  0xc8   :  { %v146_v14 = vsub.f32 0.0, %v137_v13 }
  0xc9   :  { %308 = vmatpush.msra.mxu2 %v287_v27  ;;  %401 = vmatpush.msrb.mxu3 %v287_v27 }
  0xca   :  { %v440_v15 = vpop.eup %439  ;;  %v161_v16 = vmul.f32 1.442695, %v146_v14 }
  0xcb   :  { %v442_v17 = vpop.eup %441  ;;  %v169_v18 = vadd.f32 1.0, %v440_v15  ;;  %309 = vmatpush.msra.mxu2 %v286_v28  ;;  %402 = vmatpush.msrb.mxu3 %v286_v28  ;;  %v416_v28 = vld [vmem:[%s695_s6] ss:$0 sm:$0xff]  ;;  %s563_s6 = smov [#allocation7]  }
  0xcc   :  { %443 = vpow2.f32 %v161_v16  ;;  %230 = vmatmul.f32.gmra.mxu1 %v442_v17  ;;  %s353_s12 = sshll.u32 %s563_s6, 4  ;;  %s354_s12 = int_to_ptr.vmem [resolvable:$true] %s353_s12 }
  0xcd   :  { %445 = vrcp.f32 %v169_v18  ;;  %310 = vmatpush.msra.mxu2 %v285_v29  ;;  %403 = vmatpush.msrb.mxu3 %v285_v29 }
  0xcf   :  { %311 = vmatpush.msra.mxu2 %v284_v30  ;;  %404 = vmatpush.msrb.mxu3 %v284_v30 }
  0xd1   :  { %312 = vmatpush.msra.mxu2 %v283_v31  ;;  %405 = vmatpush.msrb.mxu3 %v283_v31 }
  0xd2   :  { %v444_v19 = vpop.eup %443 }
  0xd3   :  { %v446_v20 = vpop.eup %445  ;;  %v170_v21 = vadd.f32 1.0, %v444_v19  ;;  %313 = vmatpush.msra.mxu2 %v282_v32  ;;  %406 = vmatpush.msrb.mxu3 %v282_v32 }
  0xd4   :  { %233 = vmatmul.f32.vlgmr.msra.gmra.mxu3 %v446_v20 }
  0xd5   :  { %447 = vrcp.f32 %v170_v21  ;;  %314 = vmatpush.msra.mxu2 %v281_v33  ;;  %407 = vmatpush.msrb.mxu3 %v281_v33 }
  0xd7   :  { %315 = vmatpush.msra.mxu2 %v280_v34  ;;  %408 = vmatpush.msrb.mxu3 %v280_v34 }
  0xdb   :  { %v448_v22 = vpop.eup %447 }
  0xdc   :  { %236 = vmatmul.f32.gmra.mxu3 %v448_v22 }
 0x121   :  { %v216_v36 = vpop.f32.mrf.mxu1 }
 0x122   :  { %v217_v37 = vadd.f32 %v670_v35, %v216_v36 }
 0x124   :  { %v240_v38 = vsub.f32 0.0, %v217_v37 }
 0x126   :  { %v248_v39 = vmul.f32 1.442695, %v240_v38 }
 0x128   :  { %449 = vpow2.f32 %v248_v39 }
 0x129   :  { %v219_v40 = vpop.f32.mrf.mxu1 }
 0x12a   :  { %v220_v41 = vadd.f32 %v670_v35, %v219_v40 }
 0x12c   :  { %v241_v42 = vsub.f32 0.0, %v220_v41 }
 0x12e   :  { %v450_v43 = vpop.eup %449  ;;  %v250_v44 = vmul.f32 1.442695, %v241_v42 }
 0x12f   :  { %v264_v45 = vadd.f32 1.0, %v450_v43 }
 0x130   :  { %451 = vpow2.f32 %v250_v44 }
 0x131   :  { %453 = vrcp.f32 %v264_v45  ;;  %v222_v46 = vpop.f32.mrf.mxu1 }
 0x132   :  { %v223_v47 = vadd.f32 %v670_v35, %v222_v46 }
 0x134   :  { %v242_v48 = vsub.f32 0.0, %v223_v47 }
 0x136   :  { %v452_v49 = vpop.eup %451  ;;  %v252_v50 = vmul.f32 1.442695, %v242_v48 }
 0x137   :  { %v454_v51 = vpop.eup %453  ;;  %v265_v52 = vadd.f32 1.0, %v452_v49 }
 0x138   :  { %455 = vpow2.f32 %v252_v50  ;;  %316 = vmatmul.f32.vlgmr.msra.gmra.mxu2 %v454_v51 }
 0x139   :  { %457 = vrcp.f32 %v265_v52  ;;  %v225_v53 = vpop.f32.mrf.mxu1 }
 0x13a   :  { %v226_v54 = vadd.f32 %v670_v35, %v225_v53 }
 0x13c   :  { %v243_v55 = vsub.f32 0.0, %v226_v54 }
 0x13e   :  { %v456_v56 = vpop.eup %455  ;;  %v254_v57 = vmul.f32 1.442695, %v243_v55 }
 0x13f   :  { %v458_v58 = vpop.eup %457  ;;  %v266_v59 = vadd.f32 1.0, %v456_v56 }
 0x140   :  { %459 = vpow2.f32 %v254_v57  ;;  %319 = vmatmul.f32.gmra.mxu2 %v458_v58 }
 0x141   :  { %461 = vrcp.f32 %v266_v59  ;;  %v228_v60 = vpop.f32.mrf.mxu1 }
 0x142   :  { %v229_v61 = vadd.f32 %v670_v35, %v228_v60 }
 0x144   :  { %v244_v62 = vsub.f32 0.0, %v229_v61 }
 0x146   :  { %v460_v63 = vpop.eup %459  ;;  %v256_v0 = vmul.f32 1.442695, %v244_v62 }
 0x147   :  { %v462_v1 = vpop.eup %461  ;;  %v267_v2 = vadd.f32 1.0, %v460_v63 }
 0x148   :  { %463 = vpow2.f32 %v256_v0  ;;  %322 = vmatmul.f32.gmra.mxu2 %v462_v1 }
 0x149   :  { %465 = vrcp.f32 %v267_v2  ;;  %v231_v3 = vpop.f32.mrf.mxu1 }
 0x14a   :  { %v232_v4 = vadd.f32 %v670_v35, %v231_v3 }
 0x14c   :  { %v245_v5 = vsub.f32 0.0, %v232_v4 }
 0x14e   :  { %v464_v6 = vpop.eup %463  ;;  %v258_v7 = vmul.f32 1.442695, %v245_v5 }
 0x14f   :  { %v466_v8 = vpop.eup %465  ;;  %v268_v9 = vadd.f32 1.0, %v464_v6 }
 0x150   :  { %467 = vpow2.f32 %v258_v7  ;;  %325 = vmatmul.f32.gmra.mxu2 %v466_v8 }
 0x151   :  { %469 = vrcp.f32 %v268_v9 }
 0x156   :  { %v468_v10 = vpop.eup %467 }
 0x157   :  { %v470_v11 = vpop.eup %469  ;;  %v269_v12 = vadd.f32 1.0, %v468_v10  ;;  %v234_v13 = vpop.f32.mrf.mxu3 }
 0x158   :  { %v235_v14 = vadd.f32 %v670_v35, %v234_v13  ;;  %328 = vmatmul.f32.gmra.mxu2 %v470_v11 }
 0x159   :  { %471 = vrcp.f32 %v269_v12 }
 0x15a   :  { %v246_v15 = vsub.f32 0.0, %v235_v14 }
 0x15c   :  { %v260_v16 = vmul.f32 1.442695, %v246_v15 }
 0x15e   :  { %473 = vpow2.f32 %v260_v16 }
 0x15f   :  { %v472_v17 = vpop.eup %471  ;;  %v237_v18 = vpop.f32.mrf.mxu3 }
 0x160   :  { %v238_v19 = vadd.f32 %v670_v35, %v237_v18  ;;  %331 = vmatmul.f32.gmra.mxu2 %v472_v17 }
 0x162   :  { %v247_v20 = vsub.f32 0.0, %v238_v19 }
 0x164   :  { %v474_v21 = vpop.eup %473  ;;  %v262_v22 = vmul.f32 1.442695, %v247_v20 }
 0x165   :  { %v270_v23 = vadd.f32 1.0, %v474_v21 }
 0x166   :  { %475 = vpow2.f32 %v262_v22 }
 0x167   :  { %477 = vrcp.f32 %v270_v23 }
 0x16c   :  { %v476_v24 = vpop.eup %475 }
 0x16d   :  { %v478_v25 = vpop.eup %477  ;;  %v271_v26 = vadd.f32 1.0, %v476_v24 }
 0x16e   :  { %334 = vmatmul.f32.vlgmr.msrb.gmra.mxu3 %v478_v25 }
 0x16f   :  { %479 = vrcp.f32 %v271_v26 }
 0x175   :  { %v480_v27 = vpop.eup %479 }
 0x176   :  { %337 = vmatmul.f32.gmra.mxu3 %v480_v27 }
 0x1bb   :  { %v317_v29 = vpop.f32.mrf.mxu2 }
 0x1bc   :  { %v318_v30 = vadd.f32 %v416_v28, %v317_v29 }
 0x1be   :  { %341 = vst [vmem:[#allocation7] sm:$0xff] %v318_v30 }
 0x1c3   :  { %v320_v31 = vpop.f32.mrf.mxu2 }
 0x1c4   :  { %v321_v32 = vadd.f32 %v416_v28, %v320_v31 }
 0x1c6   :  { %342 = vst [vmem:[#allocation7 + $0x8] sm:$0xff] %v321_v32 }
 0x1cb   :  { %v323_v33 = vpop.f32.mrf.mxu2 }
 0x1cc   :  { %v324_v34 = vadd.f32 %v416_v28, %v323_v33 }
 0x1ce   :  { %343 = vst [vmem:[#allocation7 + $0x10] sm:$0xff] %v324_v34 }
 0x1d3   :  { %v326_v35 = vpop.f32.mrf.mxu2 }
 0x1d4   :  { %v327_v36 = vadd.f32 %v416_v28, %v326_v35 }
 0x1d6   :  { %344 = vst [vmem:[#allocation7 + $0x18] sm:$0xff] %v327_v36 }
 0x1db   :  { %v329_v37 = vpop.f32.mrf.mxu2 }
 0x1dc   :  { %v330_v38 = vadd.f32 %v416_v28, %v329_v37 }
 0x1de   :  { %345 = vst [vmem:[#allocation7 + $0x20] sm:$0xff] %v330_v38 }
 0x1e3   :  { %v332_v39 = vpop.f32.mrf.mxu2 }
 0x1e4   :  { %v333_v40 = vadd.f32 %v416_v28, %v332_v39 }
 0x1e6   :  { %346 = vst [vmem:[#allocation7 + $0x28] sm:$0xff] %v333_v40 }
 0x1f1   :  { %v335_v41 = vpop.f32.mrf.mxu3 }
 0x1f2   :  { %v336_v42 = vadd.f32 %v416_v28, %v335_v41 }
 0x1f4   :  { %347 = vst [vmem:[#allocation7 + $0x30] sm:$0xff] %v336_v42 }
 0x1f9   :  { %v338_v43 = vpop.f32.mrf.mxu3 }
 0x1fa   :  { %v339_v44 = vadd.f32 %v416_v28, %v338_v43 }
 0x1fc   :  { %348 = vst [vmem:[#allocation7 + $0x38] sm:$0xff] %v339_v44 }
 0x1fd   :  { %361 = dma.vmem_to_hbm [thread:$0]  %s354_s12, 1024, %s356_s13, [#allocation4], %s560_s9, %s560_s9, %s561_s10  }
 0x1fe   :  { %557 = dma.done.wait [#allocation4], 1024  }
 0x1ff   :  { %558 = vsyncadd [#allocation4], 4294966272 }
 0x200   :  { %366 = vsyncpa [#allocation3], 1 }
 0x201   :  { %367 = vsyncpa [#allocation6], 1 }
 0x202   :  { %368 = vsyncpa [#allocation4], 1 }

</bundles_post_ra>
